<compile_context>
chip_gen: v6e
topology: v6e:2x2x1
jax: 0.10.0
libtpu: 0.0.40
codegen_flags: <defaults>
</compile_context>

<pallas_src>
import functools

import jax
import jax.numpy as jnp
from jax.experimental import pallas as pl
from jax.experimental.pallas import tpu as pltpu


def _round_up(x: int, m: int) -> int:
    return ((x + m - 1) // m) * m


def _ffn_kernel(x_ref, w13_ref, w2_ref, o_ref, acc_ref):
    """One (token-tile, hidden-chunk) step of the SwiGLU FFN.

    x_ref  : [tm, dim_p]        activation tile (resident across hidden axis)
    w13_ref: [dim_p, 2*th]      packed [w1 chunk | w3 chunk]
    w2_ref : [th, dim_p]        down-projection chunk
    o_ref  : [tm, dim_p]        output tile (written on last hidden step)
    acc_ref: [tm, dim_p] f32    VMEM accumulator scratch
    """
    h = pl.program_id(1)

    @pl.when(h == 0)
    def _():
        acc_ref[...] = jnp.zeros_like(acc_ref)

    th = w2_ref.shape[0]  # static block size

    x = x_ref[...].astype(w13_ref.dtype)
    # Fused gate+up projection: one matmul, split with static slices.
    h13 = jnp.dot(x, w13_ref[...], preferred_element_type=jnp.float32)
    h1 = h13[:, :th]
    h3 = h13[:, th:]
    # silu(h1) * h3 in f32 (sigmoid -> EUP, mul -> VPU).
    act = (h1 * jax.nn.sigmoid(h1)) * h3
    # Accumulate the down-projection of this hidden chunk.
    acc_ref[...] += jnp.dot(act.astype(w2_ref.dtype), w2_ref[...],
                            preferred_element_type=jnp.float32)

    @pl.when(h == pl.num_programs(1) - 1)
    def _():
        o_ref[...] = acc_ref[...].astype(o_ref.dtype)


@functools.partial(jax.jit, static_argnames=("tm", "th"))
def feed_forward(x, w1t, w3t, w2t, *, tm=256, th=512):
    """x: [T, dim] tokens; weights pre-transposed (see layout comment).

    tm: token tile (multiple of 8; 256 feeds the 256-wide MXU on v6e/v7x).
    th: hidden chunk (multiple of 128); shrink on v7x if VMEM (64 MiB) is tight.
    """
    T, dim = x.shape
    hidden = w1t.shape[1]
    assert w1t.shape == (dim, hidden)
    assert w3t.shape == (dim, hidden)
    assert w2t.shape == (hidden, dim)

    # ---- tile / padding geometry (lane-dense feature axes) -----------------
    tm = min(tm, _round_up(T, 8))
    T_pad = _round_up(T, tm)
    dim_p = _round_up(dim, 128)
    th = min(th, _round_up(hidden, 128))
    hid_p = _round_up(hidden, th)
    n_tok = T_pad // tm
    n_hid = hid_p // th

    # ---- pad + pack weights (zeros do not change the result) ---------------
    x_p = jnp.zeros((T_pad, dim_p), x.dtype).at[:T, :dim].set(x)
    w1p = jnp.zeros((dim_p, hid_p), w1t.dtype).at[:dim, :hidden].set(w1t)
    w3p = jnp.zeros((dim_p, hid_p), w3t.dtype).at[:dim, :hidden].set(w3t)
    w2p = jnp.zeros((hid_p, dim_p), w2t.dtype).at[:hidden, :dim].set(w2t)
    # Per-chunk interleave: chunk c of w13 is [w1[:, c*th:(c+1)*th] | w3[...]].
    w13 = jnp.concatenate(
        [w1p.reshape(dim_p, n_hid, 1, th), w3p.reshape(dim_p, n_hid, 1, th)],
        axis=2).reshape(dim_p, 2 * hid_p)

    # ---- VMEM budget & cost hint -------------------------------------------
    w_isz = jnp.dtype(w1t.dtype).itemsize
    x_isz = jnp.dtype(x.dtype).itemsize
    vmem_bytes = (
        2 * tm * dim_p * x_isz          # x tile (double-buffered)
        + 2 * dim_p * 2 * th * w_isz    # w13 chunk (double-buffered)
        + 2 * th * dim_p * w_isz        # w2 chunk (double-buffered)
        + 2 * tm * dim_p * x_isz        # output tile (double-buffered)
        + tm * dim_p * 4                # f32 accumulator scratch
    )
    vmem_limit = min(128 * 1024 * 1024,
                     max(32 * 1024 * 1024, int(vmem_bytes * 3 // 2)))
    cost = pl.CostEstimate(
        flops=6 * T * dim * hidden,
        transcendentals=T * hidden,
        bytes_accessed=(T * dim * x_isz                      # x in
                        + 3 * dim * hidden * w_isz           # weights
                        + T * dim * x_isz))                  # out

    out_pad = pl.pallas_call(
        _ffn_kernel,
        out_shape=jax.ShapeDtypeStruct((T_pad, dim_p), x.dtype),
        grid_spec=pltpu.PrefetchScalarGridSpec(
            num_scalar_prefetch=0,
            grid=(n_tok, n_hid),
            in_specs=[
                # x tile: resident across hidden axis (index independent of h)
                pl.BlockSpec((tm, dim_p), lambda i, h: (i, 0)),
                # packed [w1 | w3] hidden chunk, streamed along h
                pl.BlockSpec((dim_p, 2 * th), lambda i, h: (0, h)),
                # w2 hidden chunk, streamed along h
                pl.BlockSpec((th, dim_p), lambda i, h: (h, 0)),
            ],
            out_specs=pl.BlockSpec((tm, dim_p), lambda i, h: (i, 0)),
            scratch_shapes=[pltpu.VMEM((tm, dim_p), jnp.float32)],
        ),
        compiler_params=pltpu.CompilerParams(
            dimension_semantics=("parallel", "arbitrary"),
            vmem_limit_bytes=vmem_limit,
        ),
        cost_estimate=cost,
    )(x_p, w13, w2p)

    return out_pad[:T, :dim]


def feed_forward_ref(x, w1t, w3t, w2t):
    h1 = x @ w1t
    h3 = x @ w3t
    return (jax.nn.silu(h1) * h3) @ w2t


if __name__ == "__main__":
    # ModelArgs-implied small shapes: dim=32, hidden_dim=64, batch=2, seq=8
    dim, hidden = 32, 64
    batch, seq = 2, 8

    key = jax.random.PRNGKey(0)
    kx, k1, k2, k3 = jax.random.split(key, 4)

    # Deterministic "nn.Linear(bias=False)"-style params, stored transposed:
    #   PyTorch w1: [hidden, dim] -> w1t: [dim, hidden]
    #   PyTorch w2: [dim, hidden] -> w2t: [hidden, dim]
    #   PyTorch w3: [hidden, dim] -> w3t: [dim, hidden]
    w1t = (jax.random.uniform(k1, (dim, hidden), jnp.float32) - 0.5) * (2.0 / jnp.sqrt(dim))
    w2t = (jax.random.uniform(k2, (hidden, dim), jnp.float32) - 0.5) * (2.0 / jnp.sqrt(hidden))
    w3t = (jax.random.uniform(k3, (dim, hidden), jnp.float32) - 0.5) * (2.0 / jnp.sqrt(dim))

    x = jax.random.normal(kx, (batch, seq, dim), jnp.float32)
    x_tokens = x.reshape(batch * seq, dim)  # flatten (batch, seq) -> tokens

    out = feed_forward(x_tokens, w1t, w3t, w2t)
    out = jax.block_until_ready(out)

    ref = feed_forward_ref(x_tokens, w1t, w3t, w2t)
    assert out.shape == (batch * seq, dim)
    assert jnp.allclose(out, ref, atol=2e-5, rtol=2e-5), "mismatch vs reference"

    _ = out.reshape(batch, seq, dim)  # restore original leading dims
    print("KERNEL_OK")
</pallas_src>

<mosaic_0001>
module attributes {stable_mosaic.version = 11 : i64} {
  func.func @_ffn_kernel(%arg0: i32, %arg1: i32, %arg2: memref<16x128xf32, #tpu.memory_space<vmem>>, %arg3: memref<128x256xf32, #tpu.memory_space<vmem>>, %arg4: memref<128x128xf32, #tpu.memory_space<vmem>>, %arg5: memref<16x128xf32, #tpu.memory_space<vmem>>, %arg6: memref<16x128xf32, #tpu.memory_space<vmem>>) attributes {dimension_semantics = [#tpu.dimension_semantics<parallel>, #tpu.dimension_semantics<arbitrary>], iteration_bounds = array<i64: 1, 1>, scalar_prefetch = 0 : i64, scratch_operands = 1 : i64, tpu.core_type = #tpu.core_type<tc>, window_params = [{transform_indices = @transform_0, window_bounds = array<i64: 16, 128>}, {transform_indices = @transform_1, window_bounds = array<i64: 128, 256>}, {transform_indices = @transform_2, window_bounds = array<i64: 128, 128>}, {transform_indices = @transform_3, window_bounds = array<i64: 16, 128>}]} {
    %c0_i32 = arith.constant 0 : i32
    %0 = arith.cmpi eq, %arg1, %c0_i32 : i32
    %1 = arith.extui %0 : i1 to i32
    %c0_i32_0 = arith.constant 0 : i32
    %2 = arith.cmpi ne, %1, %c0_i32_0 : i32
    scf.if %2 {
      %cst_14 = arith.constant 0.000000e+00 : f32
      %23 = vector.broadcast %cst_14 : f32 to vector<16x128xf32>
      %c0_15 = arith.constant 0 : index
      %c0_16 = arith.constant 0 : index
      %24 = vector.load %arg6[%c0_15, %c0_16] : memref<16x128xf32, #tpu.memory_space<vmem>>, vector<16x128xf32>
      tpu.vector_store %arg6[%c0_15, %c0_16], %23 {strides = array<i32>} : memref<16x128xf32, #tpu.memory_space<vmem>>, vector<16x128xf32>,
    } else {
    }
    %c0 = arith.constant 0 : index
    %c0_1 = arith.constant 0 : index
    %3 = vector.load %arg2[%c0, %c0_1] : memref<16x128xf32, #tpu.memory_space<vmem>>, vector<16x128xf32>
    %c0_2 = arith.constant 0 : index
    %c0_3 = arith.constant 0 : index
    %4 = vector.load %arg3[%c0_2, %c0_3] : memref<128x256xf32, #tpu.memory_space<vmem>>, vector<128x256xf32>
    %cst = arith.constant dense<0.000000e+00> : vector<16x256xf32>
    %5 = tpu.matmul %3, %4, %cst {dimension_numbers = #tpu.dot_dimension_numbers<[1], [0], [0], [1], [0, 0, 1, 1], [], []>} : vector<16x128xf32>, vector<128x256xf32>, vector<16x256xf32> -> vector<16x256xf32>
    %6 = vector.extract_strided_slice %5 {offsets = [0, 0], sizes = [16, 128], strides = [1, 1]} : vector<16x256xf32> to vector<16x128xf32>
    %7 = vector.extract_strided_slice %5 {offsets = [0, 128], sizes = [16, 128], strides = [1, 1]} : vector<16x256xf32> to vector<16x128xf32>
    %8 = arith.negf %6 : vector<16x128xf32>
    %9 = math.exp %8 : vector<16x128xf32>
    %cst_4 = arith.constant 1.000000e+00 : f32
    %10 = vector.broadcast %cst_4 : f32 to vector<16x128xf32>
    %11 = arith.addf %10, %9 : vector<16x128xf32>
    %12 = arith.divf %10, %11 : vector<16x128xf32>
    %13 = arith.mulf %6, %12 : vector<16x128xf32>
    %14 = arith.mulf %13, %7 : vector<16x128xf32>
    %c0_5 = arith.constant 0 : index
    %c0_6 = arith.constant 0 : index
    %15 = vector.load %arg6[%c0_5, %c0_6] : memref<16x128xf32, #tpu.memory_space<vmem>>, vector<16x128xf32>
    %c0_7 = arith.constant 0 : index
    %c0_8 = arith.constant 0 : index
    %16 = vector.load %arg4[%c0_7, %c0_8] : memref<128x128xf32, #tpu.memory_space<vmem>>, vector<128x128xf32>
    %cst_9 = arith.constant dense<0.000000e+00> : vector<16x128xf32>
    %17 = tpu.matmul %14, %16, %cst_9 {dimension_numbers = #tpu.dot_dimension_numbers<[1], [0], [0], [1], [0, 0, 1, 1], [], []>} : vector<16x128xf32>, vector<128x128xf32>, vector<16x128xf32> -> vector<16x128xf32>
    %18 = arith.addf %15, %17 : vector<16x128xf32>
    %c0_10 = arith.constant 0 : index
    %c0_11 = arith.constant 0 : index
    %19 = vector.load %arg6[%c0_10, %c0_11] : memref<16x128xf32, #tpu.memory_space<vmem>>, vector<16x128xf32>
    tpu.vector_store %arg6[%c0_10, %c0_11], %18 {strides = array<i32>} : memref<16x128xf32, #tpu.memory_space<vmem>>, vector<16x128xf32>,
    %c0_i32_12 = arith.constant 0 : i32
    %20 = arith.cmpi eq, %arg1, %c0_i32_12 : i32
    %21 = arith.extui %20 : i1 to i32
    %c0_i32_13 = arith.constant 0 : i32
    %22 = arith.cmpi ne, %21, %c0_i32_13 : i32
    scf.if %22 {
      %c0_14 = arith.constant 0 : index
      %c0_15 = arith.constant 0 : index
      %23 = vector.load %arg6[%c0_14, %c0_15] : memref<16x128xf32, #tpu.memory_space<vmem>>, vector<16x128xf32>
      %c0_16 = arith.constant 0 : index
      %c0_17 = arith.constant 0 : index
      %24 = vector.load %arg5[%c0_16, %c0_17] : memref<16x128xf32, #tpu.memory_space<vmem>>, vector<16x128xf32>
      tpu.vector_store %arg5[%c0_16, %c0_17], %23 {strides = array<i32>} : memref<16x128xf32, #tpu.memory_space<vmem>>, vector<16x128xf32>,
    } else {
    }
    return
  }
  func.func @transform_0(%arg0: i32, %arg1: i32) -> (i32, i32) {
    %c0_i32 = arith.constant 0 : i32
    %c0_i32_0 = arith.constant 0 : i32
    return %arg0, %c0_i32 : i32, i32
  }
  func.func @transform_1(%arg0: i32, %arg1: i32) -> (i32, i32) {
    %c0_i32 = arith.constant 0 : i32
    %c0_i32_0 = arith.constant 0 : i32
    return %c0_i32, %arg1 : i32, i32
  }
  func.func @transform_2(%arg0: i32, %arg1: i32) -> (i32, i32) {
    %c0_i32 = arith.constant 0 : i32
    %c0_i32_0 = arith.constant 0 : i32
    return %arg1, %c0_i32 : i32, i32
  }
  func.func @transform_3(%arg0: i32, %arg1: i32) -> (i32, i32) {
    %c0_i32 = arith.constant 0 : i32
    %c0_i32_0 = arith.constant 0 : i32
    return %arg0, %c0_i32 : i32, i32
  }
}

</mosaic_0001>

<bundles_post_ra>
// kernel: feed_forward.1
= control target key start
LH: loop header
LB: loop body
LE: loop exit
PB: predicated region body
PF: predicated region fallthrough
CT: control target
= control target key end

     0   :  { %v357_v4 = vmov 0.0   ;;  %s536_s0 = inlined_call_operand.vmem [shape: f32[16,128], index: 0, kind: input, shape index: {}]   ;;  %s537_s1 = inlined_call_operand.vmem [shape: f32[128,256], index: 1, kind: input, shape index: {}]   ;;  %s538_s2 = inlined_call_operand.vmem [shape: f32[128,128], index: 2, kind: input, shape index: {}]   ;;  %s539_s3 = inlined_call_operand.hbm [shape: f32[16,128], index: 3, kind: output, shape index: {}]  }
   0x1   :  { %v54_v0 = vld [vmem:[%s537_s1 + $0xf8] sm:$0xff]  ;;  %v53_v1 = vld [vmem:[%s537_s1 + $0xf0] sm:$0xff]  ;;  %v52_v2 = vld [vmem:[%s537_s1 + $0xe8] sm:$0xff]  ;;  %119 = vmatprep.mubr.f32.mxu0 %v357_v4 }
   0x2   :  { %55 = vmatprep.subr.mxu0 %v54_v0  ;;  %v51_v3 = vld [vmem:[%s537_s1 + $0xe0] sm:$0xff]  ;;  %v50_v5 = vld [vmem:[%s537_s1 + $0xd8] sm:$0xff]  ;;  %v49_v6 = vld [vmem:[%s537_s1 + $0xd0] sm:$0xff] }
   0x3   :  { %56 = vmatpush1.msra.mxu0 %v53_v1  ;;  %v48_v7 = vld [vmem:[%s537_s1 + $0xc8] sm:$0xff]  ;;  %v47_v8 = vld [vmem:[%s537_s1 + $0xc0] sm:$0xff]  ;;  %v46_v9 = vld [vmem:[%s537_s1 + $0xb8] sm:$0xff] }
   0x4   :  { %57 = vmatprep.subr.mxu0 %v52_v2  ;;  %v45_v10 = vld [vmem:[%s537_s1 + $0xb0] sm:$0xff]  ;;  %v44_v11 = vld [vmem:[%s537_s1 + $0xa8] sm:$0xff]  ;;  %v43_v12 = vld [vmem:[%s537_s1 + $0xa0] sm:$0xff] }
   0x5   :  { %58 = vmatpush1.msra.mxu0 %v51_v3  ;;  %v42_v13 = vld [vmem:[%s537_s1 + $0x98] sm:$0xff]  ;;  %v41_v14 = vld [vmem:[%s537_s1 + $0x90] sm:$0xff] }
   0x6   :  { %59 = vmatprep.subr.mxu0 %v50_v5 }
   0x7   :  { %60 = vmatpush1.msra.mxu0 %v49_v6 }
   0x8   :  { %61 = vmatprep.subr.mxu0 %v48_v7 }
   0x9   :  { %62 = vmatpush1.msra.mxu0 %v47_v8 }
   0xa   :  { %63 = vmatprep.subr.mxu0 %v46_v9 }
   0xb   :  { %64 = vmatpush1.msra.mxu0 %v45_v10 }
   0xc   :  { %65 = vmatprep.subr.mxu0 %v44_v11 }
   0xd   :  { %8 = vsyncpa [#allocation4], 0  ;;  %66 = vmatpush1.msra.mxu0 %v43_v12  ;;  %v40_v15 = vld [vmem:[%s537_s1 + $0x88] sm:$0xff]  ;;  %v39_v16 = vld [vmem:[%s537_s1 + $0x80] sm:$0xff] }
   0xe   :  { %67 = vmatprep.subr.mxu0 %v42_v13  ;;  %v38_v17 = vld [vmem:[%s537_s1 + $0x78] sm:$0xff]  ;;  %v37_v18 = vld [vmem:[%s537_s1 + $0x70] sm:$0xff]  ;;  %v36_v19 = vld [vmem:[%s537_s1 + $0x68] sm:$0xff] }
   0xf   :  { %68 = vmatpush1.msra.mxu0 %v41_v14  ;;  %v35_v20 = vld [vmem:[%s537_s1 + $0x60] sm:$0xff]  ;;  %v34_v21 = vld [vmem:[%s537_s1 + $0x58] sm:$0xff]  ;;  %v33_v22 = vld [vmem:[%s537_s1 + $0x50] sm:$0xff] }
  0x10   :  { %69 = vmatprep.subr.mxu0 %v40_v15  ;;  %v32_v23 = vld [vmem:[%s537_s1 + $0x48] sm:$0xff]  ;;  %v31_v24 = vld [vmem:[%s537_s1 + $0x40] sm:$0xff]  ;;  %v30_v25 = vld [vmem:[%s537_s1 + $0x38] sm:$0xff] }
  0x11   :  { %70 = vmatpush1.msra.mxu0 %v39_v16  ;;  %v29_v26 = vld [vmem:[%s537_s1 + $0x30] sm:$0xff]  ;;  %v28_v27 = vld [vmem:[%s537_s1 + $0x28] sm:$0xff]  ;;  %v27_v28 = vld [vmem:[%s537_s1 + $0x20] sm:$0xff] }
  0x12   :  { %71 = vmatprep.subr.mxu0 %v38_v17  ;;  %v26_v29 = vld [vmem:[%s537_s1 + $0x18] sm:$0xff]  ;;  %v25_v30 = vld [vmem:[%s537_s1 + $0x10] sm:$0xff]  ;;  %v24_v31 = vld [vmem:[%s537_s1 + $0x8] sm:$0xff] }
  0x13   :  { %72 = vmatpush1.msra.mxu0 %v37_v18  ;;  %v23_v32 = vld [vmem:[%s537_s1] sm:$0xff]  ;;  %v22_v34 = vld [vmem:[%s536_s0 + $0x8] sm:$0xff]  ;;  %v165_v35 = vld [vmem:[%s538_s2 + $0x78] sm:$0xff] }
  0x14   :  { %73 = vmatprep.subr.mxu0 %v36_v19  ;;  %v21_v33 = vld [vmem:[%s536_s0] sm:$0xff]  ;;  %288 = vmatprep.subr.mxu1 %v165_v35  ;;  %v164_v36 = vld [vmem:[%s538_s2 + $0x70] sm:$0xff]  ;;  %v163_v37 = vld [vmem:[%s538_s2 + $0x68] sm:$0xff] }
  0x15   :  { %74 = vmatpush1.msra.mxu0 %v35_v20  ;;  %289 = vmatpush3.msra.mxu1 %v165_v35  ;;  %v162_v38 = vld [vmem:[%s538_s2 + $0x60] sm:$0xff]  ;;  %v161_v39 = vld [vmem:[%s538_s2 + $0x58] sm:$0xff]  ;;  %v160_v40 = vld [vmem:[%s538_s2 + $0x50] sm:$0xff] }
  0x16   :  { %75 = vmatprep.subr.mxu0 %v34_v21  ;;  %290 = vmatprep.subr.mxu1 %v164_v36  ;;  %v159_v41 = vld [vmem:[%s538_s2 + $0x48] sm:$0xff]  ;;  %v158_v42 = vld [vmem:[%s538_s2 + $0x40] sm:$0xff]  ;;  %v157_v43 = vld [vmem:[%s538_s2 + $0x38] sm:$0xff] }
  0x17   :  { %76 = vmatpush1.msra.mxu0 %v33_v22  ;;  %291 = vmatpush3.msra.mxu1 %v164_v36  ;;  %v156_v44 = vld [vmem:[%s538_s2 + $0x30] sm:$0xff]  ;;  %v155_v45 = vld [vmem:[%s538_s2 + $0x28] sm:$0xff]  ;;  %v154_v46 = vld [vmem:[%s538_s2 + $0x20] sm:$0xff] }
  0x18   :  { %77 = vmatprep.subr.mxu0 %v32_v23  ;;  %292 = vmatprep.subr.mxu1 %v163_v37  ;;  %v153_v47 = vld [vmem:[%s538_s2 + $0x18] sm:$0xff]  ;;  %v152_v48 = vld [vmem:[%s538_s2 + $0x10] sm:$0xff]  ;;  %v151_v49 = vld [vmem:[%s538_s2 + $0x8] sm:$0xff] }
  0x19   :  { %78 = vmatpush1.msra.mxu0 %v31_v24  ;;  %293 = vmatpush3.msra.mxu1 %v163_v37  ;;  %v150_v50 = vld [vmem:[%s538_s2] sm:$0xff]  ;;  %s358_s2 = smov [#allocation3]  }
  0x1a   :  { %79 = vmatprep.subr.mxu0 %v30_v25  ;;  %294 = vmatprep.subr.mxu1 %v162_v38  ;;  %s257_s28 = sshll.u32 %s358_s2, 4  ;;  %s258_s28 = int_to_ptr.vmem [resolvable:$true] %s257_s28 }
  0x1b   :  { %80 = vmatpush1.msra.mxu0 %v29_v26  ;;  %295 = vmatpush3.msra.mxu1 %v162_v38  ;;  %s335_s29 = scalar_lea.vmem %s258_s28, 256  ;;  %p340_p1 = scmp.lt.s32.totalorder %s258_s28, %s258_s28 }
  0x1c   :  { %81 = vmatprep.subr.mxu0 %v28_v27  ;;  %296 = vmatprep.subr.mxu1 %v161_v39  ;;  %p336_p0 = scmp.ne.s32.totalorder %s258_s28, %s335_s29  ;;  %p341_p2 = scmp.lt.s32.totalorder %s335_s29, %s335_s29 }
  0x1d   :  { %82 = vmatpush1.msra.mxu0 %v27_v28  ;;  %297 = vmatpush3.msra.mxu1 %v161_v39 }
  0x1e   :  { %83 = vmatprep.subr.mxu0 %v26_v29  ;;  %298 = vmatprep.subr.mxu1 %v160_v40  ;;  %p342_p3 = por %p341_p2, %p340_p1 }
  0x1f   :  { %84 = vmatpush1.msra.mxu0 %v25_v30  ;;  %299 = vmatpush3.msra.mxu1 %v160_v40 }
  0x20   :  { %85 = vmatprep.subr.mxu0 %v24_v31  ;;  %300 = vmatprep.subr.mxu1 %v159_v41  ;;  %p343_p4 = pnand %p342_p3, %p336_p0 }
  0x21   :  { %86 = vmatpush1.msra.mxu0 %v23_v32  ;;  %301 = vmatpush3.msra.mxu1 %v159_v41 }
  0x22   :  { %120 = vmatmul.mubr.f32.vlgmr.msra.gmra.mxu0 %v21_v33  ;;  %302 = vmatprep.subr.mxu1 %v158_v42 }
  0x23   :  { %125 = vmatprep.mubr.f32.mxu0 %v357_v4  ;;  %303 = vmatpush3.msra.mxu1 %v158_v42 }
  0x24   :  { %304 = vmatprep.subr.mxu1 %v157_v43 }
  0x25   :  { %305 = vmatpush3.msra.mxu1 %v157_v43 }
  0x26   :  { %126 = vmatmul.mubr.f32.gmra.mxu0 %v22_v34  ;;  %306 = vmatprep.subr.mxu1 %v156_v44 }
  0x27   :  { %307 = vmatpush3.msra.mxu1 %v156_v44 }
  0x28   :  { %308 = vmatprep.subr.mxu1 %v155_v45 }
  0x29   :  { %309 = vmatpush3.msra.mxu1 %v155_v45 }
  0x2a   :  { %310 = vmatprep.subr.mxu1 %v154_v46 }
  0x2b   :  { %311 = vmatpush3.msra.mxu1 %v154_v46 }
  0x2c   :  { %312 = vmatprep.subr.mxu1 %v153_v47 }
  0x2d   :  { %313 = vmatpush3.msra.mxu1 %v153_v47 }
  0x2e   :  { %314 = vmatprep.subr.mxu1 %v152_v48 }
  0x2f   :  { %315 = vmatpush3.msra.mxu1 %v152_v48 }
  0x30   :  { %316 = vmatprep.subr.mxu1 %v151_v49 }
  0x31   :  { %317 = vmatpush3.msra.mxu1 %v151_v49 }
  0x32   :  { %318 = vmatprep.subr.mxu1 %v150_v50 }
  0x33   :  { %319 = vmatpush3.msra.mxu1 %v150_v50 }
  0xe2   :  { %v121_v51 = vpop.f32.mrf.mxu0 }
  0xe3   :  { %v268_v52 = vmul.f32 -1.442695, %v121_v51 }
  0xe4   :  { %v123_v53 = vpop.f32.mrf.mxu0 }
  0xe5   :  { %327 = vpow2.f32 %v268_v52 }
  0xe6   :  { %v127_v54 = vpop.f32.mrf.mxu0 }
  0xe7   :  { %v269_v55 = vmul.f32 -1.442695, %v127_v54 }
  0xe8   :  { %v129_v1 = vpop.f32.mrf.mxu0 }
  0xe9   :  { %329 = vpow2.f32 %v269_v55 }
  0xf2   :  { %v328_v56 = vpop.eup %327 }
  0xf3   :  { %v138_v57 = vadd.f32 1.0, %v328_v56 }
  0xf5   :  { %331 = vrcp.f32 %v138_v57 }
  0xf6   :  { %v330_v58 = vpop.eup %329 }
  0xf7   :  { %v139_v59 = vadd.f32 1.0, %v330_v58 }
  0xf9   :  { %333 = vrcp.f32 %v139_v59 }
 0x102   :  { %v332_v60 = vpop.eup %331 }
 0x103   :  { %v144_v61 = vmul.f32 %v332_v60, %v121_v51 }
 0x105   :  { %v146_v62 = vmul.f32 %v144_v61, %v123_v53 }
 0x106   :  { %v334_v63 = vpop.eup %333 }
 0x107   :  { %v145_v0 = vmul.f32 %v334_v63, %v127_v54  ;;  %320 = vmatprep.mubr.f32.mxu1 %v146_v62 }
 0x109   :  { %v147_v2 = vmul.f32 %v145_v0, %v129_v1 }
 0x10b   :  { %321 = vmatmul.mubr.f32.vlgmr.msra.gmra.mxu1 %v147_v2 }
 0x1cb   :  { %v322_v3 = vpop.f32.mrf.mxu1 }
 0x1cc   :  { %251 = vst [vmem:[#allocation3 + $0x8] sm:$0xff] %v322_v3 }
 0x1cd   :  { %v232_v4 = vpop.f32.mrf.mxu1 }
 0x1ce   :  { %250 = vst [vmem:[#allocation3] sm:$0xff] %v232_v4 }
 0x1cf   :  { %346 = shalt.err (!%p343_p4)
}
 0x1d0   :  { %s359_s30 = smov 128   ;;  %s360_s0 = smov 8  }
 0x1d1   :  { %263 = dma.vmem_to_hbm [thread:$0]  %s258_s28, 256, %s539_s3, [#allocation4], %s359_s30, %s359_s30, %s360_s0  }
 0x1d2   :  { %355 = dma.done.wait [#allocation4], 256  }
 0x1d3   :  { %356 = vsyncadd [#allocation4], 4294967040 }
 0x1d4   :  { %267 = vsyncpa [#allocation4], 1 }

</bundles_post_ra>
